<compile_context>
chip_gen: v5e
topology: v5e:2x2
jax: 0.10.0
libtpu: 0.0.40
codegen_flags: <defaults>
</compile_context>

<pallas_src>
import numpy as np
import jax
import jax.numpy as jnp
from jax import lax
from jax.experimental import pallas as pl
from jax.experimental.pallas import tpu as pltpu


_NEG_INF = -1e30


def _make_spatial_attn_kernel(num_hidden, bblk, inp_dim, num_heads,
                              s_actual, s_pad, compute_dtype):
    rep = inp_dim // num_heads

    def kernel(x_ref, *rest):
        o_ref = rest[-1]           # (1, bblk, C)
        params = rest[:-1]

        for bi in range(bblk):     # static unroll over the batch block
            xb = x_ref[bi]                               # (C, S_pad)

            # Hidden 1x1 convs (channel matmuls) + ReLU.
            h = xb
            for i in range(num_hidden):
                w = params[2 * i][...]                   # (H_i, H_{i-1})
                b = params[2 * i + 1][...]               # (H_i, 1) f32
                h = jnp.maximum(
                    jnp.dot(w, h, preferred_element_type=jnp.float32) + b, 0.0
                ).astype(compute_dtype)

            wf = params[2 * num_hidden][...]             # (num_heads, H_last)
            a = jnp.dot(wf, h, preferred_element_type=jnp.float32)  # (nh, S_pad) f32

            if s_pad != s_actual:
                # Mask padded spatial lanes so they contribute nothing.
                lane = lax.broadcasted_iota(jnp.int32, a.shape, 1)
                a = jnp.where(lane < s_actual, a, _NEG_INF)

            # Max-stabilized, UNNORMALIZED softmax weights.
            m = jnp.max(a, axis=-1, keepdims=True)       # (nh, 1)
            e = jnp.exp(a - m)                           # (nh, S_pad) f32
            denom = jnp.sum(e, axis=-1, keepdims=True)   # (nh, 1)

            # Weighted spatial sum on the MXU: M[c, h] = sum_s x[c, s] * e[h, s].
            M = lax.dot_general(
                xb, e.astype(xb.dtype),
                dimension_numbers=(((1,), (1,)), ((), ())),
                preferred_element_type=jnp.float32,
            )                                            # (C, num_heads)

            # Select head c % num_heads per channel (torch channel-repeat).
            row = lax.broadcasted_iota(jnp.int32, M.shape, 0)
            col = lax.broadcasted_iota(jnp.int32, M.shape, 1)
            sel = (row % num_heads) == col
            num = jnp.sum(jnp.where(sel, M, 0.0), axis=-1, keepdims=True)  # (C, 1)

            # Per-channel normalizer: denom[c % num_heads], applied via EUP recip.
            den_c = jnp.tile(denom, (rep, 1))            # (C, 1)
            scaled = num * pl.reciprocal(den_c, approx=True)

            o_ref[0, bi, :] = scaled[:, 0].astype(o_ref.dtype)

    return kernel


def spatial_attn_forward(x_nchw, hidden_ws, hidden_bs, w_final,
                         compute_dtype=jnp.float32, block_batch=None):
    """x_nchw: (B, C, H, W); hidden_ws[i]: (H_i, H_{i-1}); hidden_bs[i]: (H_i,);
    w_final: (num_heads, H_last). Returns (B, C) float32.

    compute_dtype=jnp.bfloat16 halves HBM traffic for the dominant x read on
    v6e/v7x (accumulation stays f32); default f32 for exact parity with torch."""
    B, C, H, W = x_nchw.shape
    S = H * W
    num_heads = w_final.shape[0]
    assert C % num_heads == 0, "inp_dim must be divisible by num_heads"

    compute_dtype = jnp.dtype(compute_dtype)
    S_pad = int(pl.cdiv(S, 128)) * 128        # lane-align the spatial axis

    x = x_nchw.reshape(B, C, S).astype(compute_dtype)
    if S_pad != S:
        x = jnp.pad(x, ((0, 0), (0, 0), (0, S_pad - S)))

    # Batch-block size: big enough to amortize per-grid-step overhead / enlarge
    # DMAs, small enough to keep >=2 grid steps (v7x megacore) and to keep the
    # double-buffered x block well under the scoped VMEM budget (v7x: 64 MiB phys).
    if block_batch is None:
        vmem_budget = 8 * 1024 * 1024
        per_batch = 2 * C * S_pad * compute_dtype.itemsize  # double-buffered bytes
        bblk = max(1, min(B // 2 if B >= 2 else 1,
                          vmem_budget // max(per_batch, 1)))
    else:
        bblk = block_batch
    bblk = int(max(1, min(bblk, B)))
    nblk = int(pl.cdiv(B, bblk))
    B_pad = nblk * bblk
    if B_pad != B:
        x = jnp.pad(x, ((0, B_pad - B), (0, 0), (0, 0)))

    # Flat parameter list (biases kept f32, reshaped (Hi, 1) for lane broadcast).
    params = []
    for w, b in zip(hidden_ws, hidden_bs):
        params.append(w.astype(compute_dtype))
        params.append(b.reshape(-1, 1).astype(jnp.float32))
    params.append(w_final.astype(compute_dtype))

    in_specs = [pl.BlockSpec((bblk, C, S_pad), lambda i: (i, 0, 0))]
    for p in params:
        in_specs.append(pl.BlockSpec(p.shape, lambda i, nd=p.ndim: (0,) * nd))

    kernel = _make_spatial_attn_kernel(
        len(hidden_ws), bblk, C, num_heads, S, S_pad, compute_dtype)

    out = pl.pallas_call(
        kernel,
        out_shape=jax.ShapeDtypeStruct((nblk, bblk, C), jnp.float32),
        grid=(nblk,),
        in_specs=in_specs,
        out_specs=pl.BlockSpec((1, bblk, C), lambda i: (i, 0, 0)),
        compiler_params=pltpu.CompilerParams(
            dimension_semantics=("parallel",)),
    )(x, *params)

    return out.reshape(B_pad, C)[:B]


def spatial_attn_reference(x_nchw, hidden_ws, hidden_bs, w_final):
    """Pure-JAX reference mirroring the PyTorch forward."""
    B, C, H, W = x_nchw.shape
    S = H * W
    x = x_nchw.reshape(B, C, S).astype(jnp.float32)
    h = x
    for w, b in zip(hidden_ws, hidden_bs):
        h = jax.nn.relu(jnp.einsum("oc,bcs->bos", w, h) + b[None, :, None])
    a = jnp.einsum("oc,bcs->bos", w_final, h)            # (B, num_heads, S)
    p = jax.nn.softmax(a, axis=-1)
    rep = C // w_final.shape[0]
    pw = jnp.tile(p, (1, rep, 1))                        # (B, C, S)
    return jnp.sum(pw * x, axis=-1)                      # (B, C)


if __name__ == "__main__":
    # Small, module-consistent shapes.
    B, inp_dim, H, W = 2, 8, 16, 16
    hidden_sizes = (32, 16)
    num_heads = 4                                        # inp_dim % num_heads == 0

    key = jax.random.PRNGKey(0)
    k_x, k_w = jax.random.split(key)
    x = jax.random.normal(k_x, (B, inp_dim, H, W), dtype=jnp.float32)

    hidden_ws, hidden_bs = [], []
    prev = inp_dim
    for hs in hidden_sizes:
        k_w, k1, k2 = jax.random.split(k_w, 3)
        hidden_ws.append(0.2 * jax.random.normal(k1, (hs, prev), dtype=jnp.float32))
        hidden_bs.append(0.1 * jax.random.normal(k2, (hs,), dtype=jnp.float32))
        prev = hs
    k_w, k3 = jax.random.split(k_w)
    w_final = 0.2 * jax.random.normal(k3, (num_heads, prev), dtype=jnp.float32)

    out = spatial_attn_forward(x, hidden_ws, hidden_bs, w_final)
    out = jax.block_until_ready(out)

    ref = spatial_attn_reference(x, hidden_ws, hidden_bs, w_final)
    # Tolerance accounts for the EUP approximate reciprocal in the softmax scale.
    np.testing.assert_allclose(np.asarray(out), np.asarray(ref), rtol=2e-3, atol=2e-3)

    print("KERNEL_OK")
</pallas_src>

<mosaic_0001>
module attributes {stable_mosaic.version = 11 : i64} {
  func.func @kernel(%arg0: i32, %arg1: memref<1x8x256xf32, #tpu.memory_space<vmem>>, %arg2: memref<32x8xf32, #tpu.memory_space<vmem>>, %arg3: memref<32x1xf32, #tpu.memory_space<vmem>>, %arg4: memref<16x32xf32, #tpu.memory_space<vmem>>, %arg5: memref<16x1xf32, #tpu.memory_space<vmem>>, %arg6: memref<4x16xf32, #tpu.memory_space<vmem>>, %arg7: memref<1x1x8xf32, #tpu.memory_space<vmem>>) attributes {dimension_semantics = [#tpu.dimension_semantics<parallel>], iteration_bounds = array<i64: 2>, scalar_prefetch = 0 : i64, scratch_operands = 0 : i64, tpu.core_type = #tpu.core_type<tc>, window_params = [{transform_indices = @transform_0, window_bounds = array<i64: 1, 8, 256>}, {pipeline_mode = #tpu.pipeline_mode<synchronous>, transform_indices = @transform_1, window_bounds = array<i64: 32, 8>}, {pipeline_mode = #tpu.pipeline_mode<synchronous>, transform_indices = @transform_2, window_bounds = array<i64: 32, 1>}, {pipeline_mode = #tpu.pipeline_mode<synchronous>, transform_indices = @transform_3, window_bounds = array<i64: 16, 32>}, {pipeline_mode = #tpu.pipeline_mode<synchronous>, transform_indices = @transform_4, window_bounds = array<i64: 16, 1>}, {pipeline_mode = #tpu.pipeline_mode<synchronous>, transform_indices = @transform_5, window_bounds = array<i64: 4, 16>}, {transform_indices = @transform_6, window_bounds = array<i64: 1, 1, 8>}]} {
    %c0 = arith.constant 0 : index
    %c0_0 = arith.constant 0 : index
    %c0_1 = arith.constant 0 : index
    %0 = vector.load %arg1[%c0, %c0_0, %c0_1] : memref<1x8x256xf32, #tpu.memory_space<vmem>>, vector<1x8x256xf32>
    %1 = vector.shape_cast %0 : vector<1x8x256xf32> to vector<8x256xf32>
    %c0_2 = arith.constant 0 : index
    %c0_3 = arith.constant 0 : index
    %2 = vector.load %arg2[%c0_2, %c0_3] : memref<32x8xf32, #tpu.memory_space<vmem>>, vector<32x8xf32>
    %c0_4 = arith.constant 0 : index
    %c0_5 = arith.constant 0 : index
    %3 = vector.load %arg3[%c0_4, %c0_5] : memref<32x1xf32, #tpu.memory_space<vmem>>, vector<32x1xf32>
    %cst = arith.constant dense<0.000000e+00> : vector<32x256xf32>
    %4 = tpu.matmul %2, %1, %cst {dimension_numbers = #tpu.dot_dimension_numbers<[1], [0], [0], [1], [0, 0, 1, 1], [], []>} : vector<32x8xf32>, vector<8x256xf32>, vector<32x256xf32> -> vector<32x256xf32>
    %5 = vector.broadcast %3 : vector<32x1xf32> to vector<32x256xf32>
    %6 = arith.addf %4, %5 : vector<32x256xf32>
    %cst_6 = arith.constant 0.000000e+00 : f32
    %7 = vector.broadcast %cst_6 : f32 to vector<32x256xf32>
    %8 = arith.maximumf %6, %7 : vector<32x256xf32>
    %c0_7 = arith.constant 0 : index
    %c0_8 = arith.constant 0 : index
    %9 = vector.load %arg4[%c0_7, %c0_8] : memref<16x32xf32, #tpu.memory_space<vmem>>, vector<16x32xf32>
    %c0_9 = arith.constant 0 : index
    %c0_10 = arith.constant 0 : index
    %10 = vector.load %arg5[%c0_9, %c0_10] : memref<16x1xf32, #tpu.memory_space<vmem>>, vector<16x1xf32>
    %cst_11 = arith.constant dense<0.000000e+00> : vector<16x256xf32>
    %11 = tpu.matmul %9, %8, %cst_11 {dimension_numbers = #tpu.dot_dimension_numbers<[1], [0], [0], [1], [0, 0, 1, 1], [], []>} : vector<16x32xf32>, vector<32x256xf32>, vector<16x256xf32> -> vector<16x256xf32>
    %12 = vector.broadcast %10 : vector<16x1xf32> to vector<16x256xf32>
    %13 = arith.addf %11, %12 : vector<16x256xf32>
    %cst_12 = arith.constant 0.000000e+00 : f32
    %14 = vector.broadcast %cst_12 : f32 to vector<16x256xf32>
    %15 = arith.maximumf %13, %14 : vector<16x256xf32>
    %c0_13 = arith.constant 0 : index
    %c0_14 = arith.constant 0 : index
    %16 = vector.load %arg6[%c0_13, %c0_14] : memref<4x16xf32, #tpu.memory_space<vmem>>, vector<4x16xf32>
    %cst_15 = arith.constant dense<0.000000e+00> : vector<4x256xf32>
    %17 = tpu.matmul %16, %15, %cst_15 {dimension_numbers = #tpu.dot_dimension_numbers<[1], [0], [0], [1], [0, 0, 1, 1], [], []>} : vector<4x16xf32>, vector<16x256xf32>, vector<4x256xf32> -> vector<4x256xf32>
    %cst_16 = arith.constant dense<0xFF800000> : vector<4xf32>
    %18 = vector.multi_reduction <maximumf>, %17, %cst_16 [1] : vector<4x256xf32> to vector<4xf32>
    %19 = vector.shape_cast %18 : vector<4xf32> to vector<4x1xf32>
    %20 = vector.broadcast %19 : vector<4x1xf32> to vector<4x256xf32>
    %21 = arith.subf %17, %20 : vector<4x256xf32>
    %22 = math.exp %21 : vector<4x256xf32>
    %cst_17 = arith.constant dense<0.000000e+00> : vector<4xf32>
    %23 = vector.multi_reduction <add>, %22, %cst_17 [1] : vector<4x256xf32> to vector<4xf32>
    %24 = vector.shape_cast %23 : vector<4xf32> to vector<4x1xf32>
    %cst_18 = arith.constant dense<0.000000e+00> : vector<8x4xf32>
    %25 = tpu.matmul %1, %22, %cst_18 {dimension_numbers = #tpu.dot_dimension_numbers<[1], [1], [0], [0], [0, 0, 1, 0], [], []>} : vector<8x256xf32>, vector<4x256xf32>, vector<8x4xf32> -> vector<8x4xf32>
    %26 = tpu.iota {dimensions = array<i32: 0>} : vector<8x4xi32>
    %27 = tpu.iota {dimensions = array<i32: 1>} : vector<8x4xi32>
    %c4_i32 = arith.constant 4 : i32
    %c0_i32 = arith.constant 0 : i32
    %28 = arith.cmpi eq, %c4_i32, %c0_i32 : i32
    %c1_i32 = arith.constant 1 : i32
    %29 = arith.select %28, %c1_i32, %c4_i32 : i32
    %30 = vector.broadcast %29 : i32 to vector<8x4xi32>
    %31 = arith.remsi %26, %30 : vector<8x4xi32>
    %c0_i32_19 = arith.constant 0 : i32
    %32 = vector.broadcast %c0_i32_19 : i32 to vector<8x4xi32>
    %33 = arith.cmpi ne, %31, %32 : vector<8x4xi32>
    %c0_i32_20 = arith.constant 0 : i32
    %34 = vector.broadcast %c0_i32_20 : i32 to vector<8x4xi32>
    %35 = arith.cmpi slt, %31, %34 : vector<8x4xi32>
    %c0_i32_21 = arith.constant 0 : i32
    %36 = arith.cmpi slt, %29, %c0_i32_21 : i32
    %37 = vector.broadcast %36 : i1 to vector<8x4xi1>
    %38 = vector.broadcast %37 : vector<8x4xi1> to vector<8x4xi1>
    %39 = arith.xori %35, %38 : vector<8x4xi1>
    %40 = arith.andi %39, %33 : vector<8x4xi1>
    %41 = vector.broadcast %29 : i32 to vector<8x4xi32>
    %42 = arith.addi %31, %41 : vector<8x4xi32>
    %43 = arith.select %40, %42, %31 : vector<8x4xi1>, vector<8x4xi32>
    %44 = arith.cmpi eq, %43, %27 : vector<8x4xi32>
    %cst_22 = arith.constant 0.000000e+00 : f32
    %45 = vector.broadcast %cst_22 : f32 to vector<8x4xf32>
    %46 = arith.select %44, %25, %45 : vector<8x4xi1>, vector<8x4xf32>
    %cst_23 = arith.constant dense<0.000000e+00> : vector<8xf32>
    %47 = vector.multi_reduction <add>, %46, %cst_23 [1] : vector<8x4xf32> to vector<8xf32>
    %48 = vector.shape_cast %47 : vector<8xf32> to vector<8x1xf32>
    %49 = tpu.concatenate %24, %24 in 0 : vector<4x1xf32>, vector<4x1xf32> -> vector<8x1xf32>
    %50 = tpu.reciprocal %49 {approx = true} : vector<8x1xf32> -> vector<8x1xf32>
    %51 = arith.mulf %48, %50 : vector<8x1xf32>
    %52 = vector.shape_cast %51 : vector<8x1xf32> to vector<8xf32>
    %c0_24 = arith.constant 0 : index
    %c0_25 = arith.constant 0 : index
    %c0_26 = arith.constant 0 : index
    %53 = vector.load %arg7[%c0_24, %c0_25, %c0_26] : memref<1x1x8xf32, #tpu.memory_space<vmem>>, vector<1x1x8xf32>
    %54 = vector.shape_cast %53 : vector<1x1x8xf32> to vector<8xf32>
    %55 = vector.shape_cast %52 : vector<8xf32> to vector<1x1x8xf32>
    tpu.vector_store %arg7[%c0_24, %c0_25, %c0_26], %55 {strides = array<i32>} : memref<1x1x8xf32, #tpu.memory_space<vmem>>, vector<1x1x8xf32>,
    return
  }
  func.func @transform_0(%arg0: i32) -> (i32, i32, i32) {
    %c0_i32 = arith.constant 0 : i32
    %c0_i32_0 = arith.constant 0 : i32
    %c0_i32_1 = arith.constant 0 : i32
    return %arg0, %c0_i32, %c0_i32_0 : i32, i32, i32
  }
  func.func @transform_1(%arg0: i32) -> (i32, i32) {
    %c0_i32 = arith.constant 0 : i32
    %c0_i32_0 = arith.constant 0 : i32
    %c0_i32_1 = arith.constant 0 : i32
    return %c0_i32, %c0_i32_0 : i32, i32
  }
  func.func @transform_2(%arg0: i32) -> (i32, i32) {
    %c0_i32 = arith.constant 0 : i32
    %c0_i32_0 = arith.constant 0 : i32
    %c0_i32_1 = arith.constant 0 : i32
    return %c0_i32, %c0_i32_0 : i32, i32
  }
  func.func @transform_3(%arg0: i32) -> (i32, i32) {
    %c0_i32 = arith.constant 0 : i32
    %c0_i32_0 = arith.constant 0 : i32
    %c0_i32_1 = arith.constant 0 : i32
    return %c0_i32, %c0_i32_0 : i32, i32
  }
  func.func @transform_4(%arg0: i32) -> (i32, i32) {
    %c0_i32 = arith.constant 0 : i32
    %c0_i32_0 = arith.constant 0 : i32
    %c0_i32_1 = arith.constant 0 : i32
    return %c0_i32, %c0_i32_0 : i32, i32
  }
  func.func @transform_5(%arg0: i32) -> (i32, i32) {
    %c0_i32 = arith.constant 0 : i32
    %c0_i32_0 = arith.constant 0 : i32
    %c0_i32_1 = arith.constant 0 : i32
    return %c0_i32, %c0_i32_0 : i32, i32
  }
  func.func @transform_6(%arg0: i32) -> (i32, i32, i32) {
    %c0_i32 = arith.constant 0 : i32
    %c0_i32_0 = arith.constant 0 : i32
    %c0_i32_1 = arith.constant 0 : i32
    return %arg0, %c0_i32, %c0_i32_0 : i32, i32, i32
  }
}

</mosaic_0001>

<bundles_post_ra>
// kernel: tpu_custom_call.1
= control target key start
LH: loop header
LB: loop body
LE: loop exit
PB: predicated region body
PF: predicated region fallthrough
CT: control target
= control target key end

     0   :  { %11 = vsyncpa [#allocation3], 0  ;;  %s952_s0 = inlined_call_operand.vmem [shape: f32[2,8,256], index: 0, kind: input, shape index: {}]   ;;  %s953_s1 = inlined_call_operand.vmem [shape: f32[32,8], index: 1, kind: input, shape index: {}]   ;;  %s954_s2 = inlined_call_operand.vmem [shape: f32[32,1], index: 2, kind: input, shape index: {}]   ;;  %s955_s3 = inlined_call_operand.vmem [shape: f32[16,32], index: 3, kind: input, shape index: {}]   ;;  %s956_s4 = inlined_call_operand.vmem [shape: f32[16,1], index: 4, kind: input, shape index: {}]   ;;  %s957_s5 = inlined_call_operand.vmem [shape: f32[4,16], index: 5, kind: input, shape index: {}]   ;;  %s958_s6 = inlined_call_operand.hbm [shape: f32[2,1,8], index: 6, kind: output, shape index: {}]  }
   0x1   :  { %13 = vsyncpa [#allocation3 + $0x1], 0  ;;  %s807_s21 = smov 0   ;;  %s809_s22 = smov 0  }
   0x2   :  { %s811_s23 = smov 0   ;;  %s813_s24 = smov 0  }
   0x3 LB: > { %s828_s25 = sadd.s32 4294967295, %s769_s24   ;;  %s635_s26 = sadd.s32 4294967294, %s769_s24   ;;  %s769_s24 = sphi %s813_s24, %s964_s24   ;;  %s765_s23 = sphi %s811_s23, %s963_s23   ;;  %s761_s22 = sphi %s809_s22, %s962_s22   ;;  %s757_s21 = sphi %s807_s21, %s961_s21  }
   0x4   : > { %s832_s27 = sadd.s32 1, %s769_s24   ;;  %s157_s28 = sadd.s32 1, %s765_s23 }
   0x5   : > { %s154_s29 = ssub.s32 %s769_s24, %s832_s27  ;;  %p167_p0 = scmp.ne.s32.totalorder %s765_s23, %s761_s22 }
   0x6   : > { %p155_p1 = scmp.eq.s32.totalorder %s154_s29, 0  ;;  %p168_p2 = scmp.eq.s32.totalorder %s828_s25, 1 }
   0x7   : > { %p173_p3 = scmp.ne.s32.totalorder %s761_s22, %s757_s21  ;;  %p174_p4 = scmp.eq.s32.totalorder %s635_s26, 1 }
   0x8   : > { %s843_s30 = scalar_select %p155_p1, %s765_s23, %s157_s28  }
   0x9   : > { %p845_p5 = por %p168_p2, %p167_p0  ;;  %p849_p6 = por %p174_p4, %p173_p3 }
   0xa   : > { %p638_p7 = scmp.ge.s32.totalorder %s769_s24, 1  ;;  %p215_p8 = scmp.lt.s32.totalorder %s769_s24, 3 }
   0xc   : > { %p216_p9 = pnand %p638_p7, %p215_p8 }
   0xd   : > { %p244_p10 = scmp.lt.s32.totalorder (!%p216_p9), %s828_s25, 1  ;;  %s242_s10 = sand.u32 (!%p216_p9), 1, %s761_s22  }
   0xe   : > { %219 = sbr.rel (%p216_p9) target bundleno = 949 (0x3b5), region = 44 }
  0x13   : > { %v256_v0 = vld [vmem:[%s954_s2 + $0x8] sm:$0xff]  ;;  %v771_v1 = vmov 0   ;;  %v258_v2 = vld [vmem:[%s954_s2 + $0x18] sm:$0xff]  ;;  %s245_s13 = scalar_select %p244_p10, %s828_s25, 1  ;;  %v251_v3 = vld [vmem:[%s953_s1] sm:$0xff]  ;;  %vm279_vm0 = vcmask 64512  }
  0x14   : > { %699 = vset.pattern.permute.xlu1 %v771_v1  ;;  %698 = vset.pattern.permute.xlu0 %v771_v1  ;;  %v255_v6 = vld [vmem:[%s954_s2] sm:$0xff]  ;;  %v257_v7 = vld [vmem:[%s954_s2 + $0x10] sm:$0xff]  ;;  %v252_v8 = vld [vmem:[%s953_s1 + $0x8] sm:$0xff]  ;;  %vm372_vm1 = vcmask 261120   ;;  %vm430_vm2 = vcmask 130048   ;;  %vm474_vm3 = vcmask 1043456  }
  0x15   : > { %266 = vperm.xlu1 %699, %v256_v0   ;;  %276 = vperm.xlu0 %698, %v258_v2   ;;  %s657_s14 = sshll.u32 %s245_s13, 4  ;;  %v253_v9 = vld [vmem:[%s953_s1 + $0x10] sm:$0xff]  ;;  %v254_v10 = vld [vmem:[%s953_s1 + $0x18] sm:$0xff]  ;;  %v361_v16 = vld [vmem:[%s956_s4 + $0x8] sm:$0xff]  ;;  %vm549_vm5 = vcmask 31744   ;;  %s576_s13 = scalar_lea.hbm %s958_s6, %s828_s25  ;;  %vm565_vm6 = vcmask 57344  }
  0x16   : > { %700 = vset.pattern.permute.xlu2 %v771_v1  ;;  %s248_s17 = scalar_lea.vmem %s952_s0, %s657_s14  ;;  %v360_v20 = vld [vmem:[%s956_s4] sm:$0xff]  ;;  %v359_v42 = vld [vmem:[%s955_s3 + $0x8] sm:$0xff]  ;;  %s243_s14 = scalar_lea.vmem [#allocation2], %s242_s10 }
  0x17   : > { %v869_v4 = vld [vmem:[%s248_s17] sm:$0xff]  ;;  %v871_v5 = vld [vmem:[%s248_s17 + $0x8] sm:$0xff]  ;;  %369 = vperm.xlu2 %700, %v361_v16   ;;  %s578_s15 = sshll.u32 %s243_s14, 4  ;;  %s580_s16 = sshll.u32 %s576_s13, 4  ;;  %s579_s15 = int_to_ptr.vmem [resolvable:$true] %s578_s15  ;;  %s581_s16 = int_to_ptr.hbm [resolvable:$true] %s580_s16 }
  0x18   : > { %307 = vmatpush.msra.mxu0 %v869_v4  ;;  %336 = vmatpush.msra.mxu1 %v871_v5  ;;  %v358_v41 = vld [vmem:[%s955_s3] sm:$0xff]  ;;  %s568_s17 = scalar_lea.sflag [#allocation3], %s242_s10  ;;  %s721_s18 = sshra.s32 %s581_s16, 4  ;;  %s722_s18 = int_to_ptr.hbm [resolvable:$true] %s721_s18 }
  0x19   : > { %641 = vmatmul.msk.f32.vlgmr.msra.gmra.mxu0 %vm279_vm0, %v251_v3  ;;  %645 = vmatmul.msk.f32.vlgmr.msra.gmra.mxu1 %vm279_vm0, %v251_v3  ;;  %v429_v57 = vld [vmem:[%s957_s5] sm:$0xf]  ;;  %s723_s19 = scalar_lea.hbm %s722_s18, 1  ;;  %s727_s25 = scalar_lea.hbm %s958_s6, 2 }
  0x1a   : > { %p724_p11 = scmp.ne.s32.totalorder %s722_s18, %s723_s19  ;;  %p728_p0 = scmp.lt.s32.totalorder %s722_s18, %s958_s6 }
  0x1b   : > { %p729_p1 = scmp.lt.s32.totalorder %s727_s25, %s723_s19 }
  0x1c   : > { %p725_p12 = pnand %p724_p11, %p845_p5 }
  0x1d   : > { %261 = vperm.xlu1 %699, %v255_v6   ;;  %271 = vperm.xlu0 %698, %v257_v7   ;;  %p730_p2 = por %p729_p1, %p728_p0 }
  0x1e   : > { %p726_p13 = pneg %p725_p12 }
  0x1f   : > { %364 = vperm.xlu2 %700, %v360_v20  }
  0x20   : > { %p731_p3 = pnand %p730_p2, %p726_p13 }
  0x21   : > { %642 = vmatmul.msk.f32.gmra.mxu0 %vm279_vm0, %v252_v8  ;;  %646 = vmatmul.msk.f32.gmra.mxu1 %vm279_vm0, %v252_v8 }
  0x29   : > { %643 = vmatmul.msk.f32.gmra.mxu0 %vm279_vm0, %v253_v9  ;;  %647 = vmatmul.msk.f32.gmra.mxu1 %vm279_vm0, %v253_v9 }
  0x31   : > { %644 = vmatmul.msk.f32.gmra.mxu0 %vm279_vm0, %v254_v10  ;;  %648 = vmatmul.msk.f32.gmra.mxu1 %vm279_vm0, %v254_v10 }
  0x71   : > { %v370_v43 = vpop.permute.xlu2 %369 }
  0x79   : > { %v365_v46 = vpop.permute.xlu2 %364 }
  0x87   : > { %v277_v15 = vpop.permute.xlu0 %276  ;;  %v267_v17 = vpop.permute.xlu1 %266 }
  0x8f   : > { %v272_v21 = vpop.permute.xlu0 %271  ;;  %v262_v28 = vpop.permute.xlu1 %261 }
  0x96   : > { %v309_v11 = vpop.f32.mrf.mxu0  ;;  %v338_v12 = vpop.f32.mrf.mxu1 }
  0x97   : > { %v310_v33 = vadd.f32 %v309_v11, %v262_v28  ;;  %v339_v34 = vadd.f32 %v338_v12, %v262_v28  ;;  %v531_v11 = vlaneseq }
  0x99   : > { %v350_v39 = vmax.f32 %v310_v33, 0.0  ;;  %v351_v40 = vmax.f32 %v339_v34, 0.0  ;;  %v532_v12 = vshrl.u32 %v531_v11, 7 }
  0x9e   : > { %v312_v13 = vpop.f32.mrf.mxu0  ;;  %v341_v14 = vpop.f32.mrf.mxu1 }
  0x9f   : > { %v313_v29 = vadd.f32 %v312_v13, %v267_v17  ;;  %v342_v30 = vadd.f32 %v341_v14, %v267_v17  ;;  %v534_v13 = vand.u32 127, %v531_v11  ;;  %v539_v14 = vand.u32 3, %v532_v12 }
  0xa1   : > { %v352_v37 = vmax.f32 %v313_v29, 0.0  ;;  %v353_v38 = vmax.f32 %v342_v30, 0.0  ;;  %vm547_vm4 = vcmp.eq.s32.totalorder %v539_v14, %v534_v13 }
  0xa6   : > { %v315_v18 = vpop.f32.mrf.mxu0  ;;  %v344_v19 = vpop.f32.mrf.mxu1 }
  0xa7   : > { %v316_v24 = vadd.f32 %v315_v18, %v272_v21  ;;  %v345_v25 = vadd.f32 %v344_v19, %v272_v21 }
  0xa9   : > { %v354_v35 = vmax.f32 %v316_v24, 0.0  ;;  %v355_v36 = vmax.f32 %v345_v25, 0.0 }
  0xae   : > { %v318_v22 = vpop.f32.mrf.mxu0  ;;  %v347_v23 = vpop.f32.mrf.mxu1 }
  0xaf   : > { %v319_v26 = vadd.f32 %v318_v22, %v277_v15  ;;  %v348_v27 = vadd.f32 %v347_v23, %v277_v15 }
  0xb1   : > { %v356_v31 = vmax.f32 %v319_v26, 0.0  ;;  %v357_v32 = vmax.f32 %v348_v27, 0.0 }
  0xb3   : > { %391 = vmatpush.msra.mxu2 %v356_v31  ;;  %414 = vmatpush.msra.mxu3 %v357_v32 }
  0xb5   : > { %392 = vmatpush.msra.mxu2 %v354_v35  ;;  %415 = vmatpush.msra.mxu3 %v355_v36 }
  0xb7   : > { %393 = vmatpush.msra.mxu2 %v352_v37  ;;  %416 = vmatpush.msra.mxu3 %v353_v38 }
  0xb9   : > { %394 = vmatpush.msra.mxu2 %v350_v39  ;;  %417 = vmatpush.msra.mxu3 %v351_v40 }
  0xba   : > { %649 = vmatmul.msk.f32.vlgmr.msra.gmra.mxu2 %vm372_vm1, %v358_v41  ;;  %651 = vmatmul.msk.f32.vlgmr.msra.gmra.mxu3 %vm372_vm1, %v358_v41 }
  0xc2   : > { %650 = vmatmul.msk.f32.gmra.mxu2 %vm372_vm1, %v359_v42  ;;  %652 = vmatmul.msk.f32.gmra.mxu3 %vm372_vm1, %v359_v42 }
 0x13d   : > { %v396_v44 = vpop.f32.mrf.mxu2  ;;  %v419_v45 = vpop.f32.mrf.mxu3 }
 0x13e   : > { %v397_v49 = vadd.f32 %v396_v44, %v365_v46  ;;  %v420_v50 = vadd.f32 %v419_v45, %v365_v46 }
 0x140   : > { %v425_v55 = vmax.f32 %v397_v49, 0.0  ;;  %v426_v56 = vmax.f32 %v420_v50, 0.0 }
 0x145   : > { %v399_v47 = vpop.f32.mrf.mxu2  ;;  %v422_v48 = vpop.f32.mrf.mxu3 }
 0x146   : > { %v400_v51 = vadd.f32 %v399_v47, %v370_v43  ;;  %v423_v52 = vadd.f32 %v422_v48, %v370_v43 }
 0x148   : > { %v427_v53 = vmax.f32 %v400_v51, 0.0  ;;  %v428_v54 = vmax.f32 %v423_v52, 0.0 }
 0x14a   : > { %448 = vmatpush.msrb.mxu2 %v427_v53  ;;  %468 = vmatpush.msrb.mxu3 %v428_v54 }
 0x14c   : > { %449 = vmatpush.msrb.mxu2 %v425_v55  ;;  %469 = vmatpush.msrb.mxu3 %v426_v56 }
 0x14d   : > { %653 = vmatmul.msk.f32.vlgmr.msrb.gmra.mxu2 %vm430_vm2, %v429_v57  ;;  %654 = vmatmul.msk.f32.vlgmr.msrb.gmra.mxu3 %vm430_vm2, %v429_v57 }
 0x1d0   : > { %v451_v58 = vpop.f32.mrf.mxu2  ;;  %v471_v59 = vpop.f32.mrf.mxu3 }
 0x1d1   : > { %v475_v60 = vsel %vm474_vm3, %v451_v58, -inf  ;;  %v476_v61 = vsel %vm474_vm3, %v471_v59, -inf }
 0x1d2   : > { %v477_v62 = vmax.f32 %v475_v60, %v476_v61 }
 0x1d4   : > { %478 = vmax.xlane.f32.xlu0 %v477_v62 }
 0x247   : > { %v479_v63 = vpop.xlane.xlu0 %478 }
 0x248   : > { %v480_v0 = vsub.f32 %v451_v58, %v479_v63  ;;  %v481_v1 = vsub.f32 %v471_v59, %v479_v63 }
 0x24a   : > { %v482_v2 = vmul.f32 1.442695, %v480_v0  ;;  %v484_v3 = vmul.f32 1.442695, %v481_v1 }
 0x24c   : > { %701 = vpow2.f32 %v482_v2 }
 0x24d   : > { %703 = vpow2.f32 %v484_v3 }
 0x252   : > { %v702_v6 = vpop.eup %701 }
 0x253   : > { %v704_v7 = vpop.eup %703  ;;  %506 = vmatpush.xpose.msra.mxu2 %v702_v6  ;;  %v486_v8 = vsel %vm474_vm3, %v702_v6, 0.0 }
 0x254   : > { %526 = vmatpush.xpose.msra.mxu3 %v704_v7  ;;  %v487_v9 = vsel %vm474_vm3, %v704_v7, 0.0 }
 0x255   : > { %v488_v10 = vadd.f32 %v487_v9, %v486_v8 }
 0x256   : > { %507 = vmatmul.f32.vlgmr.msra.gmra.mxu2 %v869_v4 }
 0x257   : > { %527 = vmatmul.f32.vlgmr.msra.gmra.mxu3 %v871_v5  ;;  %489 = vadd.xlane.f32.xlu1 %v488_v10 }
 0x2ca   : > { %v490_v20 = vpop.xlane.xlu1 %489 }
 0x2cb   : > { %v554_v21 = vrot.slane %v490_v20, 4 }
 0x2cd   : > { %v556_v4 = vsel %vm474_vm3, %v490_v20, %v554_v21 }
 0x2ce   : > { %705 = vrcp.f32 %v556_v4 }
 0x2d4   : > { %v706_v5 = vpop.eup %705 }
 0x2d9   : > { %v508_v15 = vpop.f32.mrf.mxu2 }
 0x2da   : > { %v528_v16 = vpop.f32.mrf.mxu3 }
 0x2db   : > { %v529_v17 = vadd.f32 %v528_v16, %v508_v15 }
 0x2dd   : > { %v548_v18 = vsel %vm547_vm4, %v529_v17, 0.0 }
 0x2de   : > { %v550_v19 = vsel %vm549_vm5, %v548_v18, 0.0 }
 0x2df   : > { %551 = vadd.xlane.f32.xlu2 %v550_v19 }
 0x352   : > { %v552_v22 = vpop.xlane.xlu2 %551 }
 0x353   : > { %v558_v23 = vmul.f32 %v706_v5, %v552_v22 }
 0x355   : > { %561 = vperm.xlu2 %700, %v558_v23  }
 0x3af   : > { %v562_v24 = vpop.permute.xlu2 %561 }
 0x3b0   : > { %v563_v25 = vperm.slane %v562_v24, %v534_v13 }
 0x3b2   : > { %566 = vst.msk [vmem:[%s243_s14] sm:$0x1] %vm565_vm6, %v563_v25 }
 0x3b3   : > { %734 = shalt.err (!%p731_p3)
}
 0x3b4   : > { %658 = dma.vmem_to_hbm [thread:$0]  (%p845_p5), %s579_s15, 16, %s581_s16, %s568_s17  }
 0x3b5 PF: > { %p664_p4 = scmp.ge.s32.totalorder %s769_s24, 2  ;;  %s592_s9 = sand.u32 1, %s757_s21  }
 0x3b6   : > { %s593_s10 = scalar_lea.sflag [#allocation3], %s592_s9 }
 0x3b7   : > { %p661_p7 = pnand %p664_p4, %p849_p6 }
 0x3b9   : > { %p662_p8 = pneg %p661_p7 }
 0x3bb   : > { %752 = dma.done.wait (%p662_p8), %s593_s10, 16  }
 0x3bc   : > { %754 = vsyncadd (%p662_p8), %s593_s10, 4294967280  ;;  %p16_p9 = scmp.ge.s32.totalorder %s832_s27, 4   ;;  %s961_s21 = smov %s761_s22 }
 0x3bd   : > { %s962_s22 = smov %s765_s23  ;;  %s963_s23 = smov %s843_s30 }
 0x3be   : > { %s964_s24 = smov %s832_s27  ;;  %18 = sbr.rel (!%p16_p9) target bundleno = 3 (0x3), region = 79 }
 0x3c3   :  { %598 = vsyncpa [#allocation3], 1 }
 0x3c4   :  { %600 = vsyncpa [#allocation3 + $0x1], 1 }

</bundles_post_ra>
